<compile_context>
chip_gen: v7x
topology: tpu7x:2x2x1
jax: 0.10.0
libtpu: 0.0.40
codegen_flags: <defaults>
</compile_context>

<pallas_src>
import math
from functools import partial

import jax
import jax.numpy as jnp
from jax.experimental import pallas as pl
from jax.experimental.pallas import tpu as pltpu


# ----------------------------------------------------------------------------
# Pallas kernel: circular Conv1d, channels-last, whole batch per grid step
# ----------------------------------------------------------------------------
def _token_conv_kernel(x_ref, w_ref, b_ref, o_ref, *, kernel_size, padding):
    """Circular Conv1d (channels-last).

    x_ref: (bt, L, Cin)   w_ref: (K, Cin, Cout)   b_ref: (1, Cout)
    o_ref: (bt, L, Cout)

    y[n, t, o] = b[o] + sum_{k,c} w[k, c, o] * x[n, (t + k - padding) mod L, c]
    (identical to torch Conv1d(kernel_size=K, padding, padding_mode='circular'))
    """
    bt, L, Cin = x_ref.shape
    Cout = o_ref.shape[-1]
    K = kernel_size
    M = bt * L

    x = x_ref[...]
    # One doubled copy of the time axis: every circular shift below becomes a
    # static slice (replaces per-tap concatenates / HBM-level padding).
    xd = jnp.concatenate([x, x], axis=1)                       # (bt, 2L, Cin)

    # Bias folded into the accumulator init.
    acc = jnp.zeros((M, Cout), jnp.float32) + b_ref[...]
    for k in range(K):                                         # K = 3, static unroll
        s = (k - padding) % L                                  # source offset
        xs = xd[:, s:s + L, :]                                 # x[., (t+k-pad) % L, .]
        # Batch flattened into the matmul M dimension -> one fat MXU dot per tap.
        acc = acc + jnp.dot(xs.reshape(M, Cin), w_ref[k],
                            preferred_element_type=jnp.float32)
    o_ref[...] = acc.reshape(bt, L, Cout).astype(o_ref.dtype)


def token_embedding_forward(params, x, *, batch_block=None):
    """x: (N, c_in, L) float32 -> (L, N, d_model), matching TokenEmbedding.forward."""
    w, b = params["w"], params["b"]          # (K, Cin, Cout), (Cout,)
    N, Cin, L = x.shape
    K, _, Cout = w.shape
    padding = (K - 1) // 2                   # torch >= 1.5 branch (padding=1 for K=3)

    bt = N if batch_block is None else min(batch_block, N)
    assert N % bt == 0, "batch must be divisible by the batch tile"

    # Channels-last so the channel dim is the (lane-dense) minor dim.
    x_cl = jnp.transpose(x, (0, 2, 1))       # (N, L, Cin)

    y = pl.pallas_call(
        partial(_token_conv_kernel, kernel_size=K, padding=padding),
        out_shape=jax.ShapeDtypeStruct((N, L, Cout), jnp.float32),
        grid=(N // bt,),
        in_specs=[
            pl.BlockSpec((bt, L, Cin), lambda i: (i, 0, 0)),
            pl.BlockSpec((K, Cin, Cout), lambda i: (0, 0, 0)),
            pl.BlockSpec((1, Cout), lambda i: (0, 0)),
        ],
        out_specs=pl.BlockSpec((bt, L, Cout), lambda i: (i, 0, 0)),
        compiler_params=pltpu.CompilerParams(
            dimension_semantics=("parallel",)),
    )(x_cl, w, b.reshape(1, Cout))

    # Final permute to (L, N, d_model) — the module's x.permute(2, 0, 1).  Done
    # at XLA level on the tiny final output so the kernel store stays a single
    # full-tile, lane-dense write (an in-kernel (N,L,E)->(L,N,E) relayout would
    # cost more than this view-like permute).
    return jnp.transpose(y, (1, 0, 2))


# ----------------------------------------------------------------------------
# Deterministic stand-in for the module's random init
# ----------------------------------------------------------------------------
def init_token_embedding(key, c_in, d_model, kernel_size=3):
    """Conv weight ~ kaiming_normal_(mode='fan_in', nonlinearity='leaky_relu')
    (a=0 -> gain=sqrt(2)); stored as (K, Cin, Cout) == torch (Cout, Cin, K)
    transposed.  Bias ~ U(-1/sqrt(fan_in), 1/sqrt(fan_in)) (Conv1d default)."""
    kw, kb = jax.random.split(key)
    fan_in = c_in * kernel_size
    std = math.sqrt(2.0) / math.sqrt(fan_in)
    w = std * jax.random.normal(kw, (kernel_size, c_in, d_model), jnp.float32)
    bound = 1.0 / math.sqrt(fan_in)
    b = jax.random.uniform(kb, (d_model,), jnp.float32, -bound, bound)
    return {"w": w, "b": b}


def _reference_forward(params, x):
    """Pure-JAX (elementwise, fp32-exact) reference of circular conv + permute."""
    w, b = params["w"], params["b"]
    K = w.shape[0]
    pad = (K - 1) // 2
    N, Cin, L = x.shape
    xp = jnp.concatenate([x[..., L - pad:], x, x[..., :pad]], axis=-1)  # (N,Cin,L+2p)
    y = jnp.zeros((N, L, w.shape[2]), jnp.float32) + b
    for k in range(K):
        xk = xp[:, :, k:k + L]                                  # (N, Cin, L)
        y = y + jnp.sum(xk[:, :, :, None] * w[k][None, :, None, :], axis=1)
    return jnp.transpose(y, (1, 0, 2))


# ----------------------------------------------------------------------------
if __name__ == "__main__":
    c_in, d_model = 4, 32
    bsz, seq_len = 2, 16

    root = jax.random.PRNGKey(0)
    kx, kp = jax.random.split(root)
    x = jax.random.normal(kx, (bsz, c_in, seq_len), jnp.float32)
    params = init_token_embedding(kp, c_in, d_model)

    fwd = jax.jit(token_embedding_forward)
    out = fwd(params, x)
    jax.block_until_ready(out)

    assert out.shape == (seq_len, bsz, d_model)
    assert bool(jnp.all(jnp.isfinite(out)))

    # Numerical sanity check against a pure-JAX reference (loose tolerance to
    # cover MXU f32-via-bf16 accumulation passes).
    ref = _reference_forward(params, x)
    max_err = float(jnp.max(jnp.abs(out - ref)))
    assert bool(jnp.allclose(out, ref, atol=5e-2, rtol=5e-2)), max_err

    print("KERNEL_OK")
</pallas_src>

<mosaic_0001>
module attributes {stable_mosaic.version = 11 : i64} {
  func.func @_token_conv_kernel(%arg0: i32, %arg1: memref<2x16x4xf32, #tpu.memory_space<vmem>>, %arg2: memref<3x4x32xf32, #tpu.memory_space<vmem>>, %arg3: memref<1x32xf32, #tpu.memory_space<vmem>>, %arg4: memref<2x16x32xf32, #tpu.memory_space<vmem>>) attributes {dimension_semantics = [#tpu.dimension_semantics<parallel>], iteration_bounds = array<i64: 1>, scalar_prefetch = 0 : i64, scratch_operands = 0 : i64, tpu.core_type = #tpu.core_type<tc>, window_params = [{transform_indices = @transform_0, window_bounds = array<i64: 2, 16, 4>}, {pipeline_mode = #tpu.pipeline_mode<synchronous>, transform_indices = @transform_1, window_bounds = array<i64: 3, 4, 32>}, {pipeline_mode = #tpu.pipeline_mode<synchronous>, transform_indices = @transform_2, window_bounds = array<i64: 1, 32>}, {transform_indices = @transform_3, window_bounds = array<i64: 2, 16, 32>}]} {
    %c0 = arith.constant 0 : index
    %c0_0 = arith.constant 0 : index
    %c0_1 = arith.constant 0 : index
    %0 = vector.load %arg1[%c0, %c0_0, %c0_1] : memref<2x16x4xf32, #tpu.memory_space<vmem>>, vector<2x16x4xf32>
    %1 = tpu.concatenate %0, %0 in 1 : vector<2x16x4xf32>, vector<2x16x4xf32> -> vector<2x32x4xf32>
    %cst = arith.constant 0.000000e+00 : f32
    %2 = vector.broadcast %cst : f32 to vector<32x32xf32>
    %c0_2 = arith.constant 0 : index
    %c0_3 = arith.constant 0 : index
    %3 = vector.load %arg3[%c0_2, %c0_3] : memref<1x32xf32, #tpu.memory_space<vmem>>, vector<1x32xf32>
    %4 = vector.broadcast %3 : vector<1x32xf32> to vector<32x32xf32>
    %5 = arith.addf %2, %4 : vector<32x32xf32>
    %6 = vector.extract_strided_slice %1 {offsets = [0, 15, 0], sizes = [2, 16, 4], strides = [1, 1, 1]} : vector<2x32x4xf32> to vector<2x16x4xf32>
    %7 = vector.shape_cast %6 : vector<2x16x4xf32> to vector<32x4xf32>
    %c0_4 = arith.constant 0 : index
    %c0_5 = arith.constant 0 : index
    %c0_6 = arith.constant 0 : index
    %8 = vector.load %arg2[%c0_4, %c0_5, %c0_6] : memref<3x4x32xf32, #tpu.memory_space<vmem>>, vector<1x4x32xf32>
    %9 = vector.shape_cast %8 : vector<1x4x32xf32> to vector<4x32xf32>
    %cst_7 = arith.constant dense<0.000000e+00> : vector<32x32xf32>
    %10 = tpu.matmul %7, %9, %cst_7 {dimension_numbers = #tpu.dot_dimension_numbers<[1], [0], [0], [1], [0, 0, 1, 1], [], []>} : vector<32x4xf32>, vector<4x32xf32>, vector<32x32xf32> -> vector<32x32xf32>
    %11 = arith.addf %5, %10 : vector<32x32xf32>
    %12 = vector.extract_strided_slice %1 {offsets = [0, 0, 0], sizes = [2, 16, 4], strides = [1, 1, 1]} : vector<2x32x4xf32> to vector<2x16x4xf32>
    %13 = vector.shape_cast %12 : vector<2x16x4xf32> to vector<32x4xf32>
    %c1 = arith.constant 1 : index
    %c0_8 = arith.constant 0 : index
    %c0_9 = arith.constant 0 : index
    %14 = vector.load %arg2[%c1, %c0_8, %c0_9] : memref<3x4x32xf32, #tpu.memory_space<vmem>>, vector<1x4x32xf32>
    %15 = vector.shape_cast %14 : vector<1x4x32xf32> to vector<4x32xf32>
    %cst_10 = arith.constant dense<0.000000e+00> : vector<32x32xf32>
    %16 = tpu.matmul %13, %15, %cst_10 {dimension_numbers = #tpu.dot_dimension_numbers<[1], [0], [0], [1], [0, 0, 1, 1], [], []>} : vector<32x4xf32>, vector<4x32xf32>, vector<32x32xf32> -> vector<32x32xf32>
    %17 = arith.addf %11, %16 : vector<32x32xf32>
    %18 = vector.extract_strided_slice %1 {offsets = [0, 1, 0], sizes = [2, 16, 4], strides = [1, 1, 1]} : vector<2x32x4xf32> to vector<2x16x4xf32>
    %19 = vector.shape_cast %18 : vector<2x16x4xf32> to vector<32x4xf32>
    %c2 = arith.constant 2 : index
    %c0_11 = arith.constant 0 : index
    %c0_12 = arith.constant 0 : index
    %20 = vector.load %arg2[%c2, %c0_11, %c0_12] : memref<3x4x32xf32, #tpu.memory_space<vmem>>, vector<1x4x32xf32>
    %21 = vector.shape_cast %20 : vector<1x4x32xf32> to vector<4x32xf32>
    %cst_13 = arith.constant dense<0.000000e+00> : vector<32x32xf32>
    %22 = tpu.matmul %19, %21, %cst_13 {dimension_numbers = #tpu.dot_dimension_numbers<[1], [0], [0], [1], [0, 0, 1, 1], [], []>} : vector<32x4xf32>, vector<4x32xf32>, vector<32x32xf32> -> vector<32x32xf32>
    %23 = arith.addf %17, %22 : vector<32x32xf32>
    %24 = vector.shape_cast %23 : vector<32x32xf32> to vector<2x16x32xf32>
    %c0_14 = arith.constant 0 : index
    %c0_15 = arith.constant 0 : index
    %c0_16 = arith.constant 0 : index
    %25 = vector.load %arg4[%c0_14, %c0_15, %c0_16] : memref<2x16x32xf32, #tpu.memory_space<vmem>>, vector<2x16x32xf32>
    tpu.vector_store %arg4[%c0_14, %c0_15, %c0_16], %24 {strides = array<i32>} : memref<2x16x32xf32, #tpu.memory_space<vmem>>, vector<2x16x32xf32>,
    return
  }
  func.func @transform_0(%arg0: i32) -> (i32, i32, i32) {
    %c0_i32 = arith.constant 0 : i32
    %c0_i32_0 = arith.constant 0 : i32
    %c0_i32_1 = arith.constant 0 : i32
    return %arg0, %c0_i32, %c0_i32_0 : i32, i32, i32
  }
  func.func @transform_1(%arg0: i32) -> (i32, i32, i32) {
    %c0_i32 = arith.constant 0 : i32
    %c0_i32_0 = arith.constant 0 : i32
    %c0_i32_1 = arith.constant 0 : i32
    %c0_i32_2 = arith.constant 0 : i32
    return %c0_i32, %c0_i32_0, %c0_i32_1 : i32, i32, i32
  }
  func.func @transform_2(%arg0: i32) -> (i32, i32) {
    %c0_i32 = arith.constant 0 : i32
    %c0_i32_0 = arith.constant 0 : i32
    %c0_i32_1 = arith.constant 0 : i32
    return %c0_i32, %c0_i32_0 : i32, i32
  }
  func.func @transform_3(%arg0: i32) -> (i32, i32, i32) {
    %c0_i32 = arith.constant 0 : i32
    %c0_i32_0 = arith.constant 0 : i32
    %c0_i32_1 = arith.constant 0 : i32
    return %arg0, %c0_i32, %c0_i32_0 : i32, i32, i32
  }
}

</mosaic_0001>

<bundles_post_ra>
// kernel: token_embedding_forward.1
= control target key start
LH: loop header
LB: loop body
LE: loop exit
PB: predicated region body
PF: predicated region fallthrough
CT: control target
= control target key end

     0   :  { %vm49_vm0 = vcmask 1043456   ;;  %vm40_vm1 = vcmask 31744   ;;  %vm30_vm2 = vcmask 1040384   ;;  %vm244_vm3 = vcmask 1046528   ;;  %s519_s1 = inlined_call_operand.vmem [shape: f32[3,4,32], index: 1, kind: input, shape index: {}]   ;;  %s520_s0 = inlined_call_operand.vmem [shape: f32[2,16,4], index: 0, kind: input, shape index: {}]   ;;  %s521_s2 = inlined_call_operand.vmem [shape: f32[1,32], index: 2, kind: input, shape index: {}]   ;;  %s522_s3 = inlined_call_operand.vmem [shape: f32[2,16,32], index: 3, kind: output, shape index: {}]  }
   0x1   :  { %v370_v0 = vld [vmem:[%s519_s1 + $0x4] sm:$0xf]  ;;  %v39_v1 = vld [vmem:[%s519_s1] sm:$0xf]  ;;  %v16_v3 = vld [vmem:[%s520_s0 + $0x10] sm:$0xff]  ;;  %vm355_vm4 = vcmask 261120  }
   0x2   :  { %v14_v2 = vld [vmem:[%s520_s0] sm:$0xff]  ;;  %405 = vmatprep.subr.msk.mxu0 %vm49_vm0, %v370_v0  ;;  %397 = vmatprep.subr.msk.mxu1 %vm49_vm0, %v39_v1  ;;  %v17_v4 = vld [vmem:[%s520_s0 + $0x18] sm:$0xff]  ;;  %v15_v7 = vld [vmem:[%s520_s0 + $0x8] sm:$0xff]  ;;  %v36_v12 = vrot.slane %v16_v3, 7  ;;  %v249_v17 = vrot.slane %v16_v3, 1 }
   0x3   :  { %v32_v5 = vrot.slane %v14_v2, 7  ;;  %v245_v6 = vrot.slane %v14_v2, 1  ;;  %406 = vmatpush3.msk.msra.mxu0 %vm49_vm0, %v370_v0  ;;  %407 = vmatprep.mubr.msk.f32.mxu0 %vm40_vm1, %v14_v2  ;;  %v246_v8 = vrot.slane %v15_v7, 1  ;;  %v31_v9 = vrot.slane %v15_v7, 7  ;;  %v376_v10 = vld [vmem:[%s519_s1 + $0x8] sm:$0xf] }
   0x4   :  { %v35_v11 = vrot.slane %v17_v4, 7  ;;  %398 = vmatpush3.msk.msra.mxu1 %vm49_vm0, %v39_v1  ;;  %408 = vmatmul.mubr.msk.f32.vlgmr.msra.gmra.mrb[0].mxu0 %vm40_vm1, %v15_v7  ;;  %v250_v18 = vrot.slane %v17_v4, 1  ;;  %v364_v24 = vld [vmem:[%s521_s2] ss:$0 sm:$0xff] }
   0x5   :  { %v33_v13 = vsel %vm30_vm2, %v31_v9, %v32_v5  ;;  %421 = vmatprep.subr.msk.mxu1 %vm49_vm0, %v370_v0  ;;  %v34_v14 = vsel %vm30_vm2, %v32_v5, %v31_v9  ;;  %413 = vmatprep.subr.msk.mxu0 %vm49_vm0, %v376_v10  ;;  %v247_v16 = vsel %vm244_vm3, %v245_v6, %v246_v8 }
   0x6   :  { %v37_v15 = vsel %vm30_vm2, %v35_v11, %v36_v12  ;;  %399 = vmatprep.mubr.msk.f32.mxu1 %vm40_vm1, %v33_v13  ;;  %414 = vmatpush3.msk.msra.mxu0 %vm49_vm0, %v376_v10  ;;  %v38_v19 = vsel %vm30_vm2, %v36_v12, %v35_v11  ;;  %v248_v20 = vsel %vm244_vm3, %v246_v8, %v245_v6 }
   0x7   :  { %400 = vmatmul.mubr.msk.f32.vlgmr.msra.gmra.mrb[0].mxu1 %vm40_vm1, %v34_v14  ;;  %415 = vmatprep.mubr.msk.f32.mxu0 %vm40_vm1, %v247_v16  ;;  %v251_v21 = vsel %vm244_vm3, %v249_v17, %v250_v18  ;;  %v252_v22 = vsel %vm244_vm3, %v250_v18, %v249_v17 }
   0x8   :  { %422 = vmatpush3.msk.msra.mxu1 %vm49_vm0, %v370_v0  ;;  %402 = vmatprep.mubr.msk.f32.mxu1 %vm40_vm1, %v37_v15 }
   0xb   :  { %403 = vmatmul.mubr.msk.f32.gmra.mrb[2].mxu1 %vm40_vm1, %v38_v19 }
   0xc   :  { %416 = vmatmul.mubr.msk.f32.vlgmr.msra.gmra.mrb[0].mxu0 %vm40_vm1, %v248_v20  ;;  %410 = vmatprep.mubr.msk.f32.mxu1 %vm40_vm1, %v16_v3 }
   0xd   :  { %418 = vmatprep.mubr.msk.f32.mxu0 %vm40_vm1, %v251_v21 }
  0x10   :  { %419 = vmatmul.mubr.msk.f32.gmra.mrb[2].mxu0 %vm40_vm1, %v252_v22 }
  0x13   :  { %411 = vmatmul.mubr.msk.f32.vlgmr.msra.gmra.mrb[2].mxu1 %vm40_vm1, %v17_v4 }
  0xda   :  { %v401_v23 = vpop.f32.mrb[0].mxu1 }
  0xdb   :  { %v119_v25 = vpop.f32.mrb[1].mxu1  ;;  %v139_v26 = vadd.f32 %v401_v23, %v364_v24 }
  0xdc   :  { %v138_v27 = vadd.f32 %v364_v24, %v119_v25 }
  0xdf   :  { %v417_v28 = vpop.f32.mrb[0].mxu0 }
  0xe0   :  { %v424_v29 = vadd.f32 %v417_v28, %v139_v26  ;;  %v332_v30 = vpop.f32.mrb[1].mxu0 }
  0xe1   :  { %v426_v31 = vadd.f32 %v332_v30, %v138_v27 }
  0xe2   :  { %357 = vst.msk [vmem:[%s522_s3 + $0x8] sm:$0xff] %vm355_vm4, %v424_v29 }
  0xe3   :  { %356 = vst.msk [vmem:[%s522_s3] sm:$0xff] %vm355_vm4, %v426_v31  ;;  %v420_v32 = vpop.f32.mrb[2].mxu0 }
  0xe4   :  { %v342_v33 = vpop.f32.mrb[3].mxu0 }
  0xe6   :  { %v412_v34 = vpop.f32.mrb[2].mxu1 }
  0xe7   :  { %v427_v35 = vadd.f32 %v412_v34, %v364_v24  ;;  %v231_v36 = vpop.f32.mrb[3].mxu1 }
  0xe8   :  { %v429_v37 = vadd.f32 %v364_v24, %v231_v36 }
  0xe9   :  { %v428_v38 = vadd.f32 %v427_v35, %v420_v32 }
  0xea   :  { %v430_v39 = vadd.f32 %v429_v37, %v342_v33 }
  0xeb   :  { %359 = vst.msk [vmem:[%s522_s3 + $0x18] sm:$0xff] %vm355_vm4, %v428_v38 }
  0xec   :  { %358 = vst.msk [vmem:[%s522_s3 + $0x10] sm:$0xff] %vm355_vm4, %v430_v39 }

</bundles_post_ra>
